<compile_context>
chip_gen: v5e
topology: v5e:2x2
jax: 0.10.0
libtpu: 0.0.40
codegen_flags: <defaults>
</compile_context>

<pallas_src>
import functools

import jax
import jax.numpy as jnp
from jax.experimental import pallas as pl
from jax.experimental.pallas import tpu as pltpu

_LANES = 128


def _tpu_vmem_capacity():
    try:
        info = pltpu.get_tpu_info()
        cap = getattr(info, "vmem_capacity_bytes", None)
        if cap:
            return int(cap)
    except Exception:
        pass
    return 64 * 1024 * 1024                      # conservative default (v7x per-TensorCore)


_VMEM_CAP = _tpu_vmem_capacity()
_VMEM_LIMIT = min((_VMEM_CAP * 3) // 4, 96 * 1024 * 1024)   # ~48 MiB v7x, ~96 MiB v5e/v6e
_TILE_TARGET = 6 * 1024 * 1024 if _VMEM_CAP >= 100 * 1024 * 1024 else 3 * 1024 * 1024


def _round_up(n, m):
    return ((n + m - 1) // m) * m


# ---------------------------------------------------------------------------
# In-kernel helpers
# ---------------------------------------------------------------------------

def _halo_window(src_hbm, buf, sem, b, r, th, n_rt):
    """Manual, double-buffered fetch of the (th+2)-row halo window `r` of padded image `b`.

    src_hbm: (B, H+2, W+2, C) ref left in HBM (memory_space=pl.ANY).
    buf:     (2, th+2, W+2, C) VMEM scratch; sem: DMA semaphores (2,).
    Requires the row-tile grid axis to iterate sequentially ("arbitrary").
    """
    def _start(tile, slot):
        pltpu.make_async_copy(src_hbm.at[b, pl.ds(tile * th, th + 2)],
                              buf.at[slot], sem.at[slot]).start()

    @pl.when(r == 0)                 # prime the pipeline at the first row tile of each image
    def _():
        _start(0, 0)

    slot = jax.lax.rem(r, 2)
    pltpu.make_async_copy(src_hbm.at[b, pl.ds(0, th + 2)],
                          buf.at[slot], sem.at[slot]).wait()

    @pl.when(r + 1 < n_rt)           # prefetch the next window while this one is consumed
    def _():
        _start(r + 1, 1 - slot)

    return buf[slot]


def _gn_silu_conv3x3(x, mean, rstd, gamma, beta, w_ref, row0,
                     *, img_h, img_w, th, mxu_dtype):
    """GroupNorm + SiLU on a halo'd zero-padded tile, re-zero the conv 'SAME' padding, then
    3x3 conv as three per-kh (th*W, 3C)@(3C, Cout) MXU contractions (f32 accumulation).

    x: (th+2, img_w+2, C) f32, padded rows [row0, row0+th+2).  w_ref: (9*C, Cout) ref.
    Returns (th*img_w, Cout) f32.
    """
    cp = x.shape[-1]
    y = (x - mean) * rstd * gamma + beta
    a = y * jax.nn.sigmoid(y)                                    # SiLU (EUP)

    # conv zero-padding is applied AFTER GN+SiLU: mask out-of-image positions (cheap 1-D iotas)
    rows = row0 + jax.lax.broadcasted_iota(jnp.int32, (th + 2, 1, 1), 0)
    cols = jax.lax.broadcasted_iota(jnp.int32, (1, img_w + 2, 1), 1)
    valid = (rows >= 1) & (rows <= img_h) & (cols >= 1) & (cols <= img_w)
    a = jnp.where(valid, a, 0.0).astype(mxu_dtype)

    # one column-shifted concat, reused by the three kh row taps (3 shift copies, not 9)
    cols3 = jnp.concatenate([a[:, kw:kw + img_w, :] for kw in range(3)], axis=-1)

    acc = None
    for kh in range(3):
        taps = cols3[kh:kh + th].reshape(th * img_w, 3 * cp)
        part = jnp.dot(taps, w_ref[kh * 3 * cp:(kh + 1) * 3 * cp, :],
                       preferred_element_type=jnp.float32)
        acc = part if acc is None else acc + part
    return acc


# ---------------------------------------------------------------------------
# Kernels
# ---------------------------------------------------------------------------

def _stats_kernel(x_ref, s_ref):
    """Per-(batch, row-tile) channel sum / sum-of-squares partials."""
    c = x_ref.shape[-1]
    x = x_ref[0].reshape(-1, c)
    s_ref[0, 0] = jnp.concatenate(
        [jnp.sum(x, axis=0, keepdims=True),
         jnp.sum(x * x, axis=0, keepdims=True)], axis=0)


def _gn_conv1_kernel(xp_hbm, mean_ref, rstd_ref, g_ref, b_ref, w_ref, add_ref,
                     o_ref, stats_ref, xbuf, sem,
                     *, img_h, img_w, th, n_rt, mxu_dtype):
    """Fused GN + SiLU + Conv3x3 + (bias + time-embedding), plus fused GN2 partial stats."""
    b = pl.program_id(0)
    r = pl.program_id(1)
    x = _halo_window(xp_hbm, xbuf, sem, b, r, th, n_rt)
    acc = _gn_silu_conv3x3(x, mean_ref[...], rstd_ref[...], g_ref[...], b_ref[...],
                           w_ref, r * th, img_h=img_h, img_w=img_w, th=th,
                           mxu_dtype=mxu_dtype)
    h = acc + add_ref[0]                                  # conv bias + time add (pre-merged)
    o_ref[0] = h.reshape(th, img_w, -1)
    # stage-2 GroupNorm partial statistics, computed while h is still in VMEM
    stats_ref[0, 0] = jnp.concatenate(
        [jnp.sum(h, axis=0, keepdims=True),
         jnp.sum(h * h, axis=0, keepdims=True)], axis=0)


def _gn_conv2_kernel(hp_hbm, x_ref, mean_ref, rstd_ref, g_ref, b_ref, w_ref, cb_ref,
                     sw_ref, sb_ref, o_ref, hbuf, sem,
                     *, img_h, img_w, th, n_rt, project_shortcut, mxu_dtype):
    """Fused GN + SiLU + (Dropout=identity) + Conv3x3 + bias + residual shortcut."""
    b = pl.program_id(0)
    r = pl.program_id(1)
    h = _halo_window(hp_hbm, hbuf, sem, b, r, th, n_rt)
    acc = _gn_silu_conv3x3(h, mean_ref[...], rstd_ref[...], g_ref[...], b_ref[...],
                           w_ref, r * th, img_h=img_h, img_w=img_w, th=th,
                           mxu_dtype=mxu_dtype)
    acc = acc + cb_ref[...]
    cin = x_ref.shape[-1]
    xs = x_ref[0].reshape(th * img_w, cin)
    if project_shortcut:
        sc = jnp.dot(xs.astype(mxu_dtype), sw_ref[...],
                     preferred_element_type=jnp.float32) + sb_ref[...]
    else:
        cp_out = acc.shape[-1]
        if cp_out > cin:
            xs = jnp.concatenate(
                [xs, jnp.zeros((th * img_w, cp_out - cin), xs.dtype)], axis=-1)
        sc = xs
    o_ref[0] = (acc + sc).reshape(th, img_w, -1)


# ---------------------------------------------------------------------------
# Pallas wrappers
# ---------------------------------------------------------------------------

def channel_stats(x, row_tile):
    """(B, H, W, C) -> per-(batch, row-tile) channel sum / sumsq partials (B, n_r, 2, C)."""
    B, H, W, C = x.shape
    n_r = H // row_tile
    return pl.pallas_call(
        _stats_kernel,
        out_shape=jax.ShapeDtypeStruct((B, n_r, 2, C), jnp.float32),
        grid=(B, n_r),
        in_specs=[pl.BlockSpec((1, row_tile, W, C), lambda b, r: (b, r, 0, 0))],
        out_specs=pl.BlockSpec((1, 1, 2, C), lambda b, r: (b, r, 0, 0)),
        compiler_params=pltpu.CompilerParams(
            dimension_semantics=("parallel", "parallel"),
            vmem_limit_bytes=_VMEM_LIMIT),
    )(x)


def _finalize_gn_stats(stats, groups, hw, c_real, c_pad, eps):
    """Partial sums -> (mean, rstd), each (B, 1, c_pad) broadcast to channels (tiny JAX)."""
    csum = stats[:, :, 0, :c_real].sum(axis=1)              # (B, c_real)
    csq = stats[:, :, 1, :c_real].sum(axis=1)
    B = csum.shape[0]
    cg = c_real // groups
    count = float(hw * cg)
    gsum = csum.reshape(B, groups, cg).sum(-1)
    gsq = csq.reshape(B, groups, cg).sum(-1)
    mean_g = gsum / count
    var_g = jnp.maximum(gsq / count - mean_g * mean_g, 0.0)  # biased var (PyTorch GN)
    rstd_g = jax.lax.rsqrt(var_g + eps)
    pad = ((0, 0), (0, c_pad - c_real))
    mean = jnp.pad(jnp.repeat(mean_g, cg, axis=1), pad).reshape(B, 1, c_pad)
    rstd = jnp.pad(jnp.repeat(rstd_g, cg, axis=1), pad).reshape(B, 1, c_pad)
    return mean, rstd


def gn_silu_conv1(xp, mean, rstd, gamma, beta, w, add1, img_h, img_w, row_tile, mxu_dtype):
    """Fused GN+SiLU+Conv3x3(+bias+time add) over row tiles; also emits GN2 partial stats."""
    B, _, Wp, cp_in = xp.shape
    cp_out = w.shape[-1]
    n_r = img_h // row_tile
    kernel = functools.partial(_gn_conv1_kernel, img_h=img_h, img_w=img_w, th=row_tile,
                               n_rt=n_r, mxu_dtype=mxu_dtype)
    return pl.pallas_call(
        kernel,
        out_shape=(jax.ShapeDtypeStruct((B, img_h, img_w, cp_out), jnp.float32),
                   jax.ShapeDtypeStruct((B, n_r, 2, cp_out), jnp.float32)),
        grid=(B, n_r),
        in_specs=[
            pl.BlockSpec(memory_space=pl.ANY),                       # padded input stays in HBM
            pl.BlockSpec((1, 1, cp_in), lambda b, r: (b, 0, 0)),     # mean
            pl.BlockSpec((1, 1, cp_in), lambda b, r: (b, 0, 0)),     # rstd
            pl.BlockSpec((1, cp_in), lambda b, r: (0, 0)),           # gamma
            pl.BlockSpec((1, cp_in), lambda b, r: (0, 0)),           # beta
            pl.BlockSpec((9 * cp_in, cp_out), lambda b, r: (0, 0)),  # conv weights (resident)
            pl.BlockSpec((1, 1, cp_out), lambda b, r: (b, 0, 0)),    # conv bias + time add
        ],
        out_specs=(pl.BlockSpec((1, row_tile, img_w, cp_out), lambda b, r: (b, r, 0, 0)),
                   pl.BlockSpec((1, 1, 2, cp_out), lambda b, r: (b, r, 0, 0))),
        scratch_shapes=[pltpu.VMEM((2, row_tile + 2, Wp, cp_in), jnp.float32),
                        pltpu.SemaphoreType.DMA((2,))],
        compiler_params=pltpu.CompilerParams(
            dimension_semantics=("parallel", "arbitrary"),   # row axis sequential (manual DMA)
            vmem_limit_bytes=_VMEM_LIMIT),
    )(xp, mean, rstd, gamma, beta, w, add1)


def gn_silu_conv2(hp, x, mean, rstd, gamma, beta, w, cb, sw, sb,
                  img_h, img_w, row_tile, project_shortcut, mxu_dtype):
    """Fused GN+SiLU+(Dropout=identity)+Conv3x3(+bias) + residual shortcut (fused 1x1 proj)."""
    B, _, Wp, cp_h = hp.shape
    cin = x.shape[-1]
    cp_out = w.shape[-1]
    n_r = img_h // row_tile
    kernel = functools.partial(_gn_conv2_kernel, img_h=img_h, img_w=img_w, th=row_tile,
                               n_rt=n_r, project_shortcut=bool(project_shortcut),
                               mxu_dtype=mxu_dtype)
    return pl.pallas_call(
        kernel,
        out_shape=jax.ShapeDtypeStruct((B, img_h, img_w, cp_out), jnp.float32),
        grid=(B, n_r),
        in_specs=[
            pl.BlockSpec(memory_space=pl.ANY),                       # padded h1 stays in HBM
            pl.BlockSpec((1, row_tile, img_w, cin), lambda b, r: (b, r, 0, 0)),  # shortcut in
            pl.BlockSpec((1, 1, cp_h), lambda b, r: (b, 0, 0)),
            pl.BlockSpec((1, 1, cp_h), lambda b, r: (b, 0, 0)),
            pl.BlockSpec((1, cp_h), lambda b, r: (0, 0)),
            pl.BlockSpec((1, cp_h), lambda b, r: (0, 0)),
            pl.BlockSpec((9 * cp_h, cp_out), lambda b, r: (0, 0)),
            pl.BlockSpec((1, cp_out), lambda b, r: (0, 0)),
            pl.BlockSpec((cin, cp_out), lambda b, r: (0, 0)),        # 1x1 shortcut weights
            pl.BlockSpec((1, cp_out), lambda b, r: (0, 0)),
        ],
        out_specs=pl.BlockSpec((1, row_tile, img_w, cp_out), lambda b, r: (b, r, 0, 0)),
        scratch_shapes=[pltpu.VMEM((2, row_tile + 2, Wp, cp_h), jnp.float32),
                        pltpu.SemaphoreType.DMA((2,))],
        compiler_params=pltpu.CompilerParams(
            dimension_semantics=("parallel", "arbitrary"),
            vmem_limit_bytes=_VMEM_LIMIT),
    )(hp, x, mean, rstd, gamma, beta, w, cb, sw, sb)


# ---------------------------------------------------------------------------
# Wrapper-side parameter packing / tiling heuristics
# ---------------------------------------------------------------------------

def _pad_vec(v, cp):
    return jnp.pad(v.astype(jnp.float32), (0, cp - v.shape[0])).reshape(1, cp)


def _pad_conv_w(w_hwio, cp_in, cp_out, mxu_dtype):
    kh, kw, ci, co = w_hwio.shape
    w = jnp.pad(w_hwio.astype(jnp.float32),
                ((0, 0), (0, 0), (0, cp_in - ci), (0, cp_out - co)))
    return w.reshape(kh * kw * cp_in, cp_out).astype(mxu_dtype)


def _pick_row_tile(H, W, cp_in, cp_out):
    """Largest divisor of H whose per-step VMEM working set fits the per-generation target."""
    for th in range(H, 0, -1):
        if H % th:
            continue
        halo = 2 * (th + 2) * (W + 2) * cp_in * 4        # double-buffered halo window (f32)
        outb = 2 * th * W * cp_out * 4                    # double-buffered output block
        work = th * W * (cp_out + 4 * cp_in) * 4          # f32 acc + 3C column-shift concat
        if halo + outb + work <= _TILE_TARGET:
            return th
    return 1


# ---------------------------------------------------------------------------
# ResBlock forward (matches PyTorch module semantics, eval mode)
# ---------------------------------------------------------------------------

def resblock_forward(params, x_nchw, time_embed, groups, row_tile=None, eps=1e-5,
                     mxu_dtype=jnp.float32):
    B, Cin, H, W = x_nchw.shape
    Cout = params["conv1_w"].shape[-1]
    assert Cin % groups == 0 and Cout % groups == 0
    cp_in = _round_up(Cin, _LANES)
    cp_out = _round_up(Cout, _LANES)
    if row_tile is None:
        row_tile = _pick_row_tile(H, W, max(cp_in, cp_out), cp_out)
    if H % row_tile != 0:
        raise ValueError(f"row_tile {row_tile} must divide H={H}")

    x = jnp.transpose(x_nchw, (0, 2, 3, 1)).astype(jnp.float32)       # NHWC (C on lanes)

    # ---- stage 1: GN stats (Pallas partial sums + tiny JAX group combine) -------------
    s1 = channel_stats(x, row_tile)
    m1, r1 = _finalize_gn_stats(s1, groups, H * W, Cin, cp_in, eps)

    # pad ONCE: spatial conv halo + channel pad to the 128-lane width (no-op for C%128==0)
    xp = jnp.pad(x, ((0, 0), (1, 1), (1, 1), (0, cp_in - Cin)))

    # time-embedding projection (tiny: plain XLA), folded into conv1's bias operand
    if time_embed is not None:
        t = time_embed.astype(jnp.float32)
        tadd = (t * jax.nn.sigmoid(t)) @ params["proj_w"] + params["proj_b"]   # (B, Cout)
    else:
        tadd = jnp.zeros((B, Cout), jnp.float32)
    add1 = jnp.pad(params["conv1_b"][None, :] + tadd,
                   ((0, 0), (0, cp_out - Cout))).reshape(B, 1, cp_out)

    w1 = _pad_conv_w(params["conv1_w"], cp_in, cp_out, mxu_dtype)
    h1, s2 = gn_silu_conv1(xp, m1, r1,
                           _pad_vec(params["gn1_g"], cp_in), _pad_vec(params["gn1_b"], cp_in),
                           w1, add1, H, W, row_tile, mxu_dtype)

    # ---- stage 2: GN2 stats were fused into conv1's epilogue --------------------------
    m2, r2 = _finalize_gn_stats(s2, groups, H * W, Cout, cp_out, eps)
    hp = jnp.pad(h1, ((0, 0), (1, 1), (1, 1), (0, 0)))                # spatial halo only

    w2 = _pad_conv_w(params["conv2_w"], cp_out, cp_out, mxu_dtype)
    cb2 = _pad_vec(params["conv2_b"], cp_out)
    project = Cin != Cout
    if project:
        sw = jnp.pad(params["short_w"].astype(jnp.float32),
                     ((0, 0), (0, cp_out - Cout))).astype(mxu_dtype)   # (Cin, cp_out)
        sb = _pad_vec(params["short_b"], cp_out)
    else:
        sw = jnp.zeros((Cin, cp_out), mxu_dtype)                       # unused
        sb = jnp.zeros((1, cp_out), jnp.float32)

    out = gn_silu_conv2(hp, x, m2, r2,
                        _pad_vec(params["gn2_g"], cp_out), _pad_vec(params["gn2_b"], cp_out),
                        w2, cb2, sw, sb, H, W, row_tile, project, mxu_dtype)
    return jnp.transpose(out[..., :Cout], (0, 3, 1, 2))               # strip pad, back to NCHW


# ---------------------------------------------------------------------------
# Deterministic parameter init + pure-JAX reference
# ---------------------------------------------------------------------------

def init_params(key, c_in, c_out, embed_dim):
    ks = jax.random.split(key, 12)

    def uni(k, shape, fan_in):
        bound = 1.0 / float(fan_in) ** 0.5
        return jax.random.uniform(k, shape, jnp.float32, -bound, bound)

    return dict(
        gn1_g=1.0 + 0.1 * jax.random.normal(ks[0], (c_in,), jnp.float32),
        gn1_b=0.1 * jax.random.normal(ks[1], (c_in,), jnp.float32),
        conv1_w=uni(ks[2], (3, 3, c_in, c_out), 9 * c_in),   # HWIO
        conv1_b=uni(ks[3], (c_out,), 9 * c_in),
        proj_w=uni(ks[4], (embed_dim, c_out), embed_dim),
        proj_b=uni(ks[5], (c_out,), embed_dim),
        gn2_g=1.0 + 0.1 * jax.random.normal(ks[6], (c_out,), jnp.float32),
        gn2_b=0.1 * jax.random.normal(ks[7], (c_out,), jnp.float32),
        conv2_w=uni(ks[8], (3, 3, c_out, c_out), 9 * c_out),
        conv2_b=uni(ks[9], (c_out,), 9 * c_out),
        short_w=uni(ks[10], (c_in, c_out), c_in),
        short_b=uni(ks[11], (c_out,), c_in),
    )


def ref_forward(params, x_nchw, time_embed, groups, eps=1e-5):
    x = jnp.transpose(x_nchw, (0, 2, 3, 1)).astype(jnp.float32)   # NHWC

    def gn_silu(x, g, b):
        B, H, W, C = x.shape
        xg = x.reshape(B, H * W, groups, C // groups)
        m = xg.mean(axis=(1, 3), keepdims=True)
        v = xg.var(axis=(1, 3), keepdims=True)
        xn = ((xg - m) / jnp.sqrt(v + eps)).reshape(B, H, W, C)
        y = xn * g + b
        return y * jax.nn.sigmoid(y)

    def conv3(x, w, b):
        return jax.lax.conv_general_dilated(
            x, w, (1, 1), "SAME", dimension_numbers=("NHWC", "HWIO", "NHWC")) + b

    c_in = x.shape[-1]
    c_out = params["conv1_w"].shape[-1]
    sc = (jnp.einsum("bhwc,cd->bhwd", x, params["short_w"]) + params["short_b"]
          if c_in != c_out else x)
    h = gn_silu(x, params["gn1_g"], params["gn1_b"])
    h = conv3(h, params["conv1_w"], params["conv1_b"])
    if time_embed is not None:
        t = time_embed * jax.nn.sigmoid(time_embed)
        tp = t @ params["proj_w"] + params["proj_b"]
        h = h + tp[:, None, None, :]
    h = gn_silu(h, params["gn2_g"], params["gn2_b"])
    h = conv3(h, params["conv2_w"], params["conv2_b"])
    return jnp.transpose(h + sc, (0, 3, 1, 2))


# ---------------------------------------------------------------------------
if __name__ == "__main__":
    B, Cin, Cout, E, H, W, GROUPS = 2, 8, 16, 32, 16, 16, 4

    key = jax.random.PRNGKey(0)
    kx, kt, kp = jax.random.split(key, 3)
    x = jax.random.normal(kx, (B, Cin, H, W), jnp.float32)          # NCHW, as in PyTorch
    time_embed = jax.random.normal(kt, (B, E), jnp.float32)
    params = init_params(kp, Cin, Cout, E)

    ref = jax.block_until_ready(ref_forward(params, x, time_embed, GROUPS))

    # exact-parity path (f32 MXU operands); row_tile=8 -> 2 row tiles, exercises the
    # double-buffered halo DMA and the fused GN2-stats epilogue.
    out = jax.block_until_ready(
        resblock_forward(params, x, time_embed, GROUPS, row_tile=8,
                         mxu_dtype=jnp.float32))
    assert out.shape == (B, Cout, H, W), out.shape
    err = float(jnp.max(jnp.abs(out - ref)))
    assert jnp.allclose(out, ref, atol=2e-3, rtol=2e-3), err

    # production path: bf16 at the MXU boundary (f32 accumulation) -> looser tolerance.
    out_bf16 = jax.block_until_ready(
        resblock_forward(params, x, time_embed, GROUPS, row_tile=8,
                         mxu_dtype=jnp.bfloat16))
    err_bf16 = float(jnp.max(jnp.abs(out_bf16 - ref)))
    assert jnp.allclose(out_bf16, ref, atol=1e-1, rtol=5e-2), err_bf16

    print("KERNEL_OK")
</pallas_src>

<mosaic_0001>
module attributes {stable_mosaic.version = 11 : i64} {
  func.func @_stats_kernel(%arg0: i32, %arg1: i32, %arg2: memref<1x8x16x8xf32, #tpu.memory_space<vmem>>, %arg3: memref<1x1x2x8xf32, #tpu.memory_space<vmem>>) attributes {dimension_semantics = [#tpu.dimension_semantics<parallel>, #tpu.dimension_semantics<parallel>], iteration_bounds = array<i64: 2, 2>, scalar_prefetch = 0 : i64, scratch_operands = 0 : i64, tpu.core_type = #tpu.core_type<tc>, window_params = [{transform_indices = @transform_0, window_bounds = array<i64: 1, 8, 16, 8>}, {transform_indices = @transform_1, window_bounds = array<i64: 1, 1, 2, 8>}]} {
    %c0 = arith.constant 0 : index
    %c0_0 = arith.constant 0 : index
    %c0_1 = arith.constant 0 : index
    %c0_2 = arith.constant 0 : index
    %0 = vector.load %arg2[%c0, %c0_0, %c0_1, %c0_2] : memref<1x8x16x8xf32, #tpu.memory_space<vmem>>, vector<1x8x16x8xf32>
    %1 = vector.shape_cast %0 : vector<1x8x16x8xf32> to vector<8x16x8xf32>
    %2 = vector.shape_cast %1 : vector<8x16x8xf32> to vector<128x8xf32>
    %cst = arith.constant dense<0.000000e+00> : vector<8xf32>
    %3 = vector.multi_reduction <add>, %2, %cst [0] : vector<128x8xf32> to vector<8xf32>
    %4 = vector.shape_cast %3 : vector<8xf32> to vector<1x8xf32>
    %5 = arith.mulf %2, %2 : vector<128x8xf32>
    %cst_3 = arith.constant dense<0.000000e+00> : vector<8xf32>
    %6 = vector.multi_reduction <add>, %5, %cst_3 [0] : vector<128x8xf32> to vector<8xf32>
    %7 = vector.shape_cast %6 : vector<8xf32> to vector<1x8xf32>
    %8 = tpu.concatenate %4, %7 in 0 : vector<1x8xf32>, vector<1x8xf32> -> vector<2x8xf32>
    %c0_4 = arith.constant 0 : index
    %c0_5 = arith.constant 0 : index
    %c0_6 = arith.constant 0 : index
    %c0_7 = arith.constant 0 : index
    %9 = vector.load %arg3[%c0_4, %c0_5, %c0_6, %c0_7] : memref<1x1x2x8xf32, #tpu.memory_space<vmem>>, vector<1x1x2x8xf32>
    %10 = vector.shape_cast %9 : vector<1x1x2x8xf32> to vector<2x8xf32>
    %11 = vector.shape_cast %8 : vector<2x8xf32> to vector<1x1x2x8xf32>
    tpu.vector_store %arg3[%c0_4, %c0_5, %c0_6, %c0_7], %11 {strides = array<i32>} : memref<1x1x2x8xf32, #tpu.memory_space<vmem>>, vector<1x1x2x8xf32>,
    return
  }
  func.func @transform_0(%arg0: i32, %arg1: i32) -> (i32, i32, i32, i32) {
    %c0_i32 = arith.constant 0 : i32
    %c0_i32_0 = arith.constant 0 : i32
    %c0_i32_1 = arith.constant 0 : i32
    return %arg0, %arg1, %c0_i32, %c0_i32_0 : i32, i32, i32, i32
  }
  func.func @transform_1(%arg0: i32, %arg1: i32) -> (i32, i32, i32, i32) {
    %c0_i32 = arith.constant 0 : i32
    %c0_i32_0 = arith.constant 0 : i32
    %c0_i32_1 = arith.constant 0 : i32
    return %arg0, %arg1, %c0_i32, %c0_i32_0 : i32, i32, i32, i32
  }
}

</mosaic_0001>

<bundles_post_ra>
// kernel: tpu_custom_call.1
= control target key start
LH: loop header
LB: loop body
LE: loop exit
PB: predicated region body
PF: predicated region fallthrough
CT: control target
= control target key end

     0   :  { %6 = vsyncpa [#allocation3], 0  ;;  %s721_s0 = inlined_call_operand.vmem [shape: f32[2,16,16,8], index: 0, kind: input, shape index: {}]   ;;  %s722_s1 = inlined_call_operand.hbm [shape: f32[2,2,2,8], index: 1, kind: output, shape index: {}]  }
   0x1   :  { %8 = vsyncpa [#allocation3 + $0x1], 0  ;;  %s550_s6 = smov 0   ;;  %s552_s7 = smov 0  }
   0x2   :  { %s554_s8 = smov 0   ;;  %s556_s9 = smov 0  }
   0x3   :  { %s558_s10 = smov 0   ;;  %s560_s11 = smov 0  }
   0x4   :  { %s562_s12 = smov 0   ;;  %s564_s13 = smov 0  }
   0x5 LB: > { %s358_s14 = sadd.s32 4294967295, %s538_s13   ;;  %s359_s15 = sadd.s32 4294967294, %s538_s13   ;;  %s538_s13 = sphi %s564_s13, %s14_s13   ;;  %s534_s12 = sphi %s562_s12, %s731_s12   ;;  %s530_s11 = sphi %s560_s11, %s730_s11   ;;  %s526_s10 = sphi %s558_s10, %s729_s10   ;;  %s522_s9 = sphi %s556_s9, %s728_s9   ;;  %s518_s8 = sphi %s554_s8, %s727_s8   ;;  %s514_s7 = sphi %s552_s7, %s726_s7   ;;  %s510_s6 = sphi %s550_s6, %s725_s6  }
   0x6   : > { %s23_s16 = sadd.s32 1, %s530_s11  ;;  %s26_s17 = sadd.s32 1, %s534_s12 }
   0x7   : > { %p24_p0 = scmp.ge.s32.totalorder %s23_s16, 2  ;;  %p73_p1 = scmp.ne.s32.totalorder %s518_s8, %s514_s7 }
   0x8   : > { %p74_p2 = scmp.eq.s32.totalorder %s358_s14, 3  ;;  %p79_p5 = scmp.ne.s32.totalorder %s514_s7, %s510_s6 }
   0x9   : > { %s733_s16 = smov (%p24_p0, %s23_s16), 0  ;;  %s735_s17 = smov (!%p24_p0, %s26_s17), %s534_s12 }
   0xa   : > { %s59_s18 = ssub.s32 %s530_s11, %s733_s16  ;;  %p601_p3 = por %p74_p2, %p73_p1 }
   0xb   : > { %p28_p4 = scmp.ge.s32.totalorder %s735_s17, 2  ;;  %p80_p6 = scmp.eq.s32.totalorder %s359_s15, 3 }
   0xc   : > { %p362_p7 = scmp.ge.s32.totalorder %s538_s13, 1  ;;  %p112_p9 = scmp.lt.s32.totalorder %s538_s13, 5 }
   0xd   : > { %s737_s17 = smov (%p28_p4, %s735_s17), 0  ;;  %p610_p8 = por %p80_p6, %p79_p5 }
   0xe   : > { %s58_s21 = ssub.s32 %s534_s12, %s737_s17  ;;  %s63_s22 = sadd.s32 1, %s518_s8 }
   0xf   : > { %s60_s23 = sor.u32 %s59_s18, %s58_s21  ;;  %p113_p10 = pnand %p362_p7, %p112_p9 }
  0x10   : > { %p61_p11 = scmp.eq.s32.totalorder %s60_s23, 0  ;;  %s364_s25 = sshll.u32 (!%p113_p10), %s522_s9, 3 }
  0x11   : > { %116 = sbr.rel (%p113_p10) target bundleno = 79 (0x4f), region = 24  ;;  %p138_p12 = scmp.lt.s32.totalorder (!%p113_p10), %s526_s10, 1 }
  0x12   : > { %s619_s24 = scalar_select %p61_p11, %s518_s8, %s63_s22  }
  0x13   : > { %p140_p13 = scmp.lt.s32.totalorder (!%p113_p10), %s364_s25, 15  ;;  %s369_s5 = sshll.u32 (!%p113_p10), %s526_s10, 1 }
  0x14   : > { %s134_s14 = sand.u32 (!%p113_p10), 1, %s514_s7   ;;  %s270_s15 = sadd.s32 (!%p113_p10), %s522_s9, %s369_s5 }
  0x15   : > { %s363_s18 = sshll.u32 (!%p113_p10), %s134_s14, 1  ;;  %s370_s21 = sshll.u32 (!%p113_p10), %s270_s15, 1 }
  0x16   : > { %s139_s26 = scalar_select %p138_p12, %s526_s10, 1  ;;  %vm164_vm0 = vcmask 64512   ;;  %vm255_vm1 = vcmask 1040384   ;;  %vm257_vm2 = vcmask 58368  }
  0x17   : > { %s739_s25 = smov (!%p140_p13, %s364_s25), 15  ;;  %s260_s9 = scalar_lea.sflag [#allocation3], %s134_s14 }
  0x18   : > { %s366_s27 = sshll.u32 %s139_s26, 5  ;;  %s365_s28 = sshll.u32 %s739_s25, 1 }
  0x19   : > { %s144_s29 = sadd.s32 %s366_s27, %s365_s28  ;;  %s272_s25 = scalar_lea.hbm %s722_s1, %s370_s21 }
  0x1a   : > { %s367_s30 = sshll.u32 %s144_s29, 3  ;;  %s136_s26 = scalar_lea.vmem [#allocation2], %s363_s18 }
  0x1b   : > { %s627_s4 = scalar_lea.vmem %s721_s0, %s367_s30  ;;  %s274_s10 = sshll.u32 %s136_s26, 4  ;;  %s275_s10 = int_to_ptr.vmem [resolvable:$true] %s274_s10 }
  0x1c   : > { %v148_v0 = vld [vmem:[%s627_s4] sm:$0xff]  ;;  %v149_v1 = vld [vmem:[%s627_s4 + $0x8] sm:$0xff]  ;;  %v150_v2 = vld [vmem:[%s627_s4 + $0x10] sm:$0xff]  ;;  %s276_s27 = sshll.u32 %s272_s25, 4  ;;  %s464_s3 = scalar_lea.hbm %s722_s1, 8  ;;  %s277_s27 = int_to_ptr.hbm [resolvable:$true] %s276_s27 }
  0x1d   : > { %v165_v3 = vsel %vm164_vm0, %v148_v0, 0.0  ;;  %v166_v4 = vsel %vm164_vm0, %v149_v1, 0.0  ;;  %v168_v5 = vsel %vm164_vm0, %v150_v2, 0.0  ;;  %v151_v6 = vld [vmem:[%s627_s4 + $0x18] sm:$0xff]  ;;  %v152_v9 = vld [vmem:[%s627_s4 + $0x20] sm:$0xff]  ;;  %v153_v12 = vld [vmem:[%s627_s4 + $0x28] sm:$0xff]  ;;  %v202_v14 = vmul.f32 %v148_v0, %v148_v0 }
  0x1e   : > { %v167_v7 = vadd.f32 %v166_v4, %v165_v3  ;;  %v170_v8 = vsel %vm164_vm0, %v151_v6, 0.0  ;;  %v172_v11 = vsel %vm164_vm0, %v152_v9, 0.0  ;;  %v203_v15 = vmul.f32 %v149_v1, %v149_v1  ;;  %v154_v18 = vld [vmem:[%s627_s4 + $0x30] sm:$0xff]  ;;  %v155_v23 = vld [vmem:[%s627_s4 + $0x38] sm:$0xff]  ;;  %v156_v30 = vld [vmem:[%s627_s4 + $0x40] sm:$0xff]  ;;  %s458_s28 = sshra.s32 %s277_s27, 4  ;;  %s459_s28 = int_to_ptr.hbm [resolvable:$true] %s458_s28 }
  0x1f   : > { %v204_v16 = vmul.f32 %v150_v2, %v150_v2  ;;  %v174_v17 = vsel %vm164_vm0, %v153_v12, 0.0  ;;  %v205_v20 = vmul.f32 %v151_v6, %v151_v6  ;;  %v176_v21 = vsel %vm164_vm0, %v154_v18, 0.0  ;;  %v157_v36 = vld [vmem:[%s627_s4 + $0x48] sm:$0xff]  ;;  %v158_v42 = vld [vmem:[%s627_s4 + $0x50] sm:$0xff]  ;;  %v159_v48 = vld [vmem:[%s627_s4 + $0x58] sm:$0xff]  ;;  %s460_s29 = scalar_lea.hbm %s459_s28, 2  ;;  %p465_p4 = scmp.lt.s32.totalorder %s459_s28, %s722_s1 }
  0x20   : > { %v169_v10 = vadd.f32 %v168_v5, %v167_v7  ;;  %v206_v22 = vmul.f32 %v152_v9, %v152_v9  ;;  %v218_v25 = vsel %vm164_vm0, %v202_v14, 0.0  ;;  %v219_v26 = vsel %vm164_vm0, %v203_v15, 0.0  ;;  %v160_v54 = vld [vmem:[%s627_s4 + $0x60] sm:$0xff]  ;;  %v161_v60 = vld [vmem:[%s627_s4 + $0x68] sm:$0xff]  ;;  %v162_v2 = vld [vmem:[%s627_s4 + $0x70] sm:$0xff]  ;;  %p461_p0 = scmp.ne.s32.totalorder %s459_s28, %s460_s29  ;;  %p466_p5 = scmp.lt.s32.totalorder %s464_s3, %s460_s29 }
  0x21   : > { %v221_v27 = vsel %vm164_vm0, %v204_v16, 0.0  ;;  %v178_v28 = vsel %vm164_vm0, %v155_v23, 0.0  ;;  %v220_v29 = vadd.f32 %v219_v26, %v218_v25  ;;  %v207_v32 = vmul.f32 %v153_v12, %v153_v12 }
  0x22   : > { %v171_v13 = vadd.f32 %v170_v8, %v169_v10  ;;  %v223_v33 = vsel %vm164_vm0, %v205_v20, 0.0  ;;  %v180_v34 = vsel %vm164_vm0, %v156_v30, 0.0  ;;  %v208_v38 = vmul.f32 %v154_v18, %v154_v18  ;;  %v163_v8 = vld [vmem:[%s627_s4 + $0x78] sm:$0xff]  ;;  %p462_p1 = pnand %p461_p0, %p601_p3  ;;  %p467_p6 = por %p466_p5, %p465_p4 }
  0x23   : > { %v222_v35 = vadd.f32 %v221_v27, %v220_v29  ;;  %v225_v39 = vsel %vm164_vm0, %v206_v22, 0.0  ;;  %v182_v40 = vsel %vm164_vm0, %v157_v36, 0.0  ;;  %v209_v44 = vmul.f32 %v155_v23, %v155_v23 }
  0x24   : > { %v173_v19 = vadd.f32 %v172_v11, %v171_v13  ;;  %v227_v45 = vsel %vm164_vm0, %v207_v32, 0.0  ;;  %v184_v46 = vsel %vm164_vm0, %v158_v42, 0.0  ;;  %v210_v50 = vmul.f32 %v156_v30, %v156_v30  ;;  %p463_p2 = pneg %p462_p1 }
  0x25   : > { %v224_v41 = vadd.f32 %v223_v33, %v222_v35  ;;  %v229_v51 = vsel %vm164_vm0, %v208_v38, 0.0  ;;  %v186_v52 = vsel %vm164_vm0, %v159_v48, 0.0  ;;  %v211_v56 = vmul.f32 %v157_v36, %v157_v36 }
  0x26   : > { %v175_v24 = vadd.f32 %v174_v17, %v173_v19  ;;  %v231_v57 = vsel %vm164_vm0, %v209_v44, 0.0  ;;  %v188_v58 = vsel %vm164_vm0, %v160_v54, 0.0  ;;  %v212_v62 = vmul.f32 %v158_v42, %v158_v42  ;;  %p468_p7 = pnand %p467_p6, %p463_p2 }
  0x27   : > { %v226_v47 = vadd.f32 %v225_v39, %v224_v41  ;;  %v233_v63 = vsel %vm164_vm0, %v210_v50, 0.0  ;;  %v190_v0 = vsel %vm164_vm0, %v161_v60, 0.0  ;;  %v213_v4 = vmul.f32 %v159_v48, %v159_v48 }
  0x28   : > { %v177_v31 = vadd.f32 %v176_v21, %v175_v24  ;;  %v235_v5 = vsel %vm164_vm0, %v211_v56, 0.0  ;;  %v192_v6 = vsel %vm164_vm0, %v162_v2, 0.0  ;;  %v214_v10 = vmul.f32 %v160_v54, %v160_v54 }
  0x29   : > { %v228_v53 = vadd.f32 %v227_v45, %v226_v47  ;;  %v237_v11 = vsel %vm164_vm0, %v212_v62, 0.0  ;;  %v194_v12 = vsel %vm164_vm0, %v163_v8, 0.0  ;;  %v215_v15 = vmul.f32 %v161_v60, %v161_v60 }
  0x2a   : > { %v179_v37 = vadd.f32 %v178_v28, %v177_v31  ;;  %v239_v16 = vsel %vm164_vm0, %v213_v4, 0.0  ;;  %v216_v19 = vmul.f32 %v162_v2, %v162_v2  ;;  %v241_v20 = vsel %vm164_vm0, %v214_v10, 0.0 }
  0x2b   : > { %v230_v59 = vadd.f32 %v229_v51, %v228_v53  ;;  %v217_v23 = vmul.f32 %v163_v8, %v163_v8  ;;  %v243_v24 = vsel %vm164_vm0, %v215_v15, 0.0 }
  0x2c   : > { %v181_v43 = vadd.f32 %v180_v34, %v179_v37  ;;  %v245_v27 = vsel %vm164_vm0, %v216_v19, 0.0 }
  0x2d   : > { %v232_v1 = vadd.f32 %v231_v57, %v230_v59  ;;  %v247_v29 = vsel %vm164_vm0, %v217_v23, 0.0 }
  0x2e   : > { %v183_v49 = vadd.f32 %v182_v40, %v181_v43 }
  0x2f   : > { %v234_v7 = vadd.f32 %v233_v63, %v232_v1 }
  0x30   : > { %v185_v55 = vadd.f32 %v184_v46, %v183_v49 }
  0x31   : > { %v236_v13 = vadd.f32 %v235_v5, %v234_v7 }
  0x32   : > { %v187_v61 = vadd.f32 %v186_v52, %v185_v55 }
  0x33   : > { %v238_v17 = vadd.f32 %v237_v11, %v236_v13 }
  0x34   : > { %v189_v3 = vadd.f32 %v188_v58, %v187_v61 }
  0x35   : > { %v240_v21 = vadd.f32 %v239_v16, %v238_v17 }
  0x36   : > { %v191_v9 = vadd.f32 %v190_v0, %v189_v3 }
  0x37   : > { %v242_v25 = vadd.f32 %v241_v20, %v240_v21 }
  0x38   : > { %v193_v14 = vadd.f32 %v192_v6, %v191_v9 }
  0x39   : > { %v244_v28 = vadd.f32 %v243_v24, %v242_v25 }
  0x3a   : > { %v195_v18 = vadd.f32 %v194_v12, %v193_v14 }
  0x3b   : > { %v246_v31 = vadd.f32 %v245_v27, %v244_v28 }
  0x3c   : > { %v196_v22 = vrot.slane %v195_v18, 4 }
  0x3d   : > { %v248_v32 = vadd.f32 %v247_v29, %v246_v31 }
  0x3e   : > { %v197_v26 = vadd.f32 %v196_v22, %v195_v18 }
  0x3f   : > { %v249_v34 = vrot.slane %v248_v32, 4 }
  0x40   : > { %v198_v30 = vrot.slane %v197_v26, 2 }
  0x41   : > { %v250_v35 = vadd.f32 %v249_v34, %v248_v32 }
  0x42   : > { %v199_v33 = vadd.f32 %v198_v30, %v197_v26 }
  0x43   : > { %v251_v37 = vrot.slane %v250_v35, 2 }
  0x44   : > { %v200_v36 = vrot.slane %v199_v33, 1 }
  0x45   : > { %v252_v38 = vadd.f32 %v251_v37, %v250_v35 }
  0x46   : > { %v201_v39 = vadd.f32 %v200_v36, %v199_v33 }
  0x47   : > { %v253_v40 = vrot.slane %v252_v38, 1 }
  0x49   : > { %v254_v41 = vadd.f32 %v253_v40, %v252_v38 }
  0x4b   : > { %v256_v42 = vsel %vm255_vm1, %v201_v39, %v254_v41 }
  0x4c   : > { %258 = vst.msk [vmem:[%s136_s26] sm:$0x3] %vm257_vm2, %v256_v42 }
  0x4d   : > { %471 = shalt.err (!%p468_p7)
}
  0x4e   : > { %373 = dma.vmem_to_hbm [thread:$0]  (%p601_p3), %s275_s10, 32, %s277_s27, %s260_s9  }
  0x4f PF: > { %p379_p9 = scmp.ge.s32.totalorder %s538_s13, 2  ;;  %s288_s14 = sand.u32 1, %s510_s6  }
  0x50   : > { %s289_s15 = scalar_lea.sflag [#allocation3], %s288_s14 }
  0x51   : > { %p376_p10 = pnand %p379_p9, %p610_p8 }
  0x53   : > { %p377_p11 = pneg %p376_p10 }
  0x55   : > { %505 = dma.done.wait (%p377_p11), %s289_s15, 32  }
  0x56   : > { %507 = vsyncadd (%p377_p11), %s289_s15, 4294967264  ;;  %s14_s13 = sadd.s32 1, %s538_s13   ;;  %s725_s6 = smov %s514_s7 }
  0x57   : > { %p11_p12 = scmp.ge.s32.totalorder %s14_s13, 6   ;;  %s726_s7 = smov %s518_s8 }
  0x58   : > { %s727_s8 = smov %s619_s24  ;;  %s728_s9 = smov %s530_s11 }
  0x59   : > { %s729_s10 = smov %s534_s12  ;;  %s730_s11 = smov %s733_s16 }
  0x5a   : > { %s731_s12 = smov %s737_s17  ;;  %13 = sbr.rel (!%p11_p12) target bundleno = 5 (0x5), region = 59 }
  0x5f   :  { %295 = vsyncpa [#allocation3], 1 }
  0x60   :  { %297 = vsyncpa [#allocation3 + $0x1], 1 }

</bundles_post_ra>
